<compile_context>
chip_gen: v7x
topology: tpu7x:2x2x1
jax: 0.10.0
libtpu: 0.0.40
codegen_flags: <defaults>
</compile_context>

<pallas_src>
import functools

import jax
import jax.numpy as jnp
from jax.experimental import pallas as pl
from jax.experimental.pallas import tpu as pltpu

# corner sign pattern of create_corners(): i, j, k in [1, -1] nested loops
# (host-side helpers only; the kernel uses static Python signs).
_SX = (1.0, 1.0, 1.0, 1.0, -1.0, -1.0, -1.0, -1.0)
_SY = (1.0, 1.0, -1.0, -1.0, 1.0, 1.0, -1.0, -1.0)
_SZ = (1.0, -1.0, 1.0, -1.0, 1.0, -1.0, 1.0, -1.0)


def _iou_loss_kernel(x_ref, o_ref, *, batch, total_lanes):
    """One batch tile.  x_ref: [24, 8, TL]  (feature, sublane-batch, lane-batch).

    Feature rows: 0-3 gt_box2d, 4 gt_theta_ray, 5-7 reg_dims (h,w,l),
    8 reg_alphas, 9-11 reg_loc (x,y,z), 12-23 calib (3x4 row-major).
    """
    x = x_ref[...]                                      # [24, 8, TL] f32
    tl = x.shape[2]

    def trunc_f32(v):                                   # numpy-style int cast (toward zero)
        return v.astype(jnp.int32).astype(jnp.float32)

    gt_x1 = trunc_f32(x[0])
    gt_y1 = trunc_f32(x[1])
    gt_x2 = trunc_f32(x[2])
    gt_y2 = trunc_f32(x[3])
    theta = x[4]
    h, wdim, ldim = x[5], x[6], x[7]
    alpha = x[8]
    lx, ly, lz = x[9], x[10], x[11]
    p = [x[12 + i] for i in range(12)]                  # calib rows, hoisted slices

    # ---- global yaw + rotated half-extent products, once per tile ----
    ry = alpha + theta
    c = jnp.cos(ry)
    s = jnp.sin(ry)
    hl = ldim * 0.5
    hw = wdim * 0.5
    hh = h * 0.5
    chl = c * hl      # cos(ry) * l/2
    shl = s * hl      # sin(ry) * l/2
    chw = c * hw      # cos(ry) * w/2
    shw = s * hw      # sin(ry) * w/2
    n_chl, n_shl, n_chw, n_shw, n_hh = -chl, -shl, -chw, -shw, -hh

    # ---- 8 corners, unrolled; corner signs are Python-static so the per-corner
    #      work is just adds + the 3x4 projection + one divide (no iota/where). ----
    pminx = pmaxx = pminy = pmaxy = None
    for k in range(8):
        pos_x = (k & 4) == 0
        pos_y = (k & 2) == 0
        pos_z = (k & 1) == 0
        Xw = ((chl if pos_x else n_chl) + (shw if pos_z else n_shw)) + lx
        Yw = (hh if pos_y else n_hh) + ly
        Zw = ((n_shl if pos_x else shl) + (chw if pos_z else n_chw)) + lz
        u = p[0] * Xw + p[1] * Yw + p[2] * Zw + p[3]
        v = p[4] * Xw + p[5] * Yw + p[6] * Zw + p[7]
        w = p[8] * Xw + p[9] * Yw + p[10] * Zw + p[11]
        inv_w = 1.0 / w                                 # exact; approx rcp could flip a pixel
        px = (u * inv_w).astype(jnp.int32)              # trunc like the numpy int cast
        py = (v * inv_w).astype(jnp.int32)
        if k == 0:
            pminx = pmaxx = px
            pminy = pmaxy = py
        else:
            pminx = jnp.minimum(pminx, px)
            pmaxx = jnp.maximum(pmaxx, px)
            pminy = jnp.minimum(pminy, py)
            pmaxy = jnp.maximum(pmaxy, py)

    prj_x1 = pminx.astype(jnp.float32)
    prj_y1 = pminy.astype(jnp.float32)
    prj_x2 = pmaxx.astype(jnp.float32)
    prj_y2 = pmaxy.astype(jnp.float32)

    # ---- calc_IoU_2d() tail in f32 (exact: pixel-coordinate products << 2^24) ----
    area1 = (gt_x2 - gt_x1) * (gt_y2 - gt_y1)
    area2 = (prj_x2 - prj_x1) * (prj_y2 - prj_y1)
    area_sum = jnp.abs(area1) + jnp.abs(area2)
    ix1 = jnp.maximum(gt_x1, prj_x1)
    iy1 = jnp.maximum(gt_y1, prj_y1)
    ix2 = jnp.minimum(gt_x2, prj_x2)
    iy2 = jnp.minimum(gt_y2, prj_y2)
    valid = jnp.logical_and(ix1 < ix2, iy1 < iy2)
    overlap = jnp.abs((ix2 - ix1) * (iy2 - iy1))
    union = area_sum - overlap
    iou = jnp.where(valid, overlap / jnp.where(union == 0.0, 1.0, union), 0.0)

    # ---- mask padded samples (global index >= batch; their features are zero,
    #      so w=0 -> garbage that must never reach the sum), then reduce the
    #      tile down to one lane-dense (1, TL) row of per-column partial sums. ----
    sub = jax.lax.broadcasted_iota(jnp.int32, (8, tl), 0)
    lane = jax.lax.broadcasted_iota(jnp.int32, (8, tl), 1)
    gidx = sub * total_lanes + (pl.program_id(0) * tl + lane)
    # iou is in [0, 1], so |1 - iou| == 1 - iou (F.l1_loss(1, iou)).
    contrib = jnp.where(gidx < batch, 1.0 - iou, 0.0)
    o_ref[...] = jnp.sum(contrib, axis=0, keepdims=True)   # (1, TL)


@functools.partial(jax.jit, static_argnames=("weight", "block_b"))
def iou_loss(gt_box2d, gt_theta_ray, reg_dims, reg_alphas, reg_loc, calib,
             weight=1.0, block_b=16384):
    B = gt_box2d.shape[0]
    f32 = jnp.float32

    # Feature-major packing built directly as [24, B] (no [B,24] -> .T pass).
    feat = jnp.concatenate([
        jnp.asarray(gt_box2d, f32).reshape(B, 4).T,
        jnp.asarray(gt_theta_ray, f32).reshape(1, B),
        jnp.asarray(reg_dims, f32).reshape(B, 3).T,
        jnp.asarray(reg_alphas, f32).reshape(1, B),
        jnp.asarray(reg_loc, f32).reshape(B, 3).T,
        jnp.asarray(calib, f32).reshape(B, 12).T,
    ], axis=0)                                           # [24, B]

    # Batch folded onto (8 sublanes) x (lanes); tile the lane axis.
    lanes_needed = pl.cdiv(B, 8)
    tl_cap = max(128, (max(int(block_b), 1024) // 8) // 128 * 128)
    tl_need = pl.cdiv(lanes_needed, 128) * 128
    tl = min(tl_cap, tl_need)
    if tl_need >= 2 * 128:
        # v7x megacore: keep >= 2 grid steps so both TensorCores get work.
        tl = min(tl, pl.cdiv(pl.cdiv(lanes_needed, 2), 128) * 128)
    g = pl.cdiv(lanes_needed, tl)
    lp = g * tl                                          # total lanes
    bp = 8 * lp                                          # padded batch

    feat = jnp.pad(feat, ((0, 0), (0, bp - B)))          # fusible lane-axis pad
    feat = feat.reshape(24, 8, lp)                       # free row-major reshape

    kern = functools.partial(_iou_loss_kernel, batch=B, total_lanes=lp)
    partial_sums = pl.pallas_call(
        kern,
        out_shape=jax.ShapeDtypeStruct((1, g * tl), jnp.float32),
        grid=(g,),
        in_specs=[pl.BlockSpec((24, 8, tl), lambda i: (0, 0, i))],
        out_specs=pl.BlockSpec((1, tl), lambda i: (0, i)),
        compiler_params=pltpu.CompilerParams(
            dimension_semantics=("parallel",),
            vmem_limit_bytes=32 * 1024 * 1024),
    )(feat)

    # Tiny g*tl-length reduction + weight/mean in plain JAX.
    return jnp.sum(partial_sums) * (float(weight) / float(B))


# ---------------------------------------------------------------------------
# Host-side helpers (test harness only).
# ---------------------------------------------------------------------------
def _project_box2d_host(ry, loc, dims, P):
    """Plain-JAX replica of loc3d_2_box2d_np — used to synthesize gt boxes."""
    h, w, l = dims[0], dims[1], dims[2]
    sx = jnp.array(_SX)
    sy = jnp.array(_SY)
    sz = jnp.array(_SZ)
    X = l / 2 * sx
    Y = h / 2 * sy
    Z = w / 2 * sz
    c, s = jnp.cos(ry), jnp.sin(ry)
    Xw = c * X + s * Z + loc[0]
    Yw = Y + loc[1]
    Zw = -s * X + c * Z + loc[2]
    pts = jnp.stack([Xw, Yw, Zw, jnp.ones_like(Xw)], axis=0)   # [4,8]
    prj = P @ pts                                              # [3,8]
    px = (prj[0] / prj[2]).astype(jnp.int32)
    py = (prj[1] / prj[2]).astype(jnp.int32)
    return jnp.array([px.min(), py.min(), px.max(), py.max()], jnp.float32)


def _iou_loss_ref(gt_box2d, gt_theta_ray, reg_dims, reg_alphas, reg_loc,
                  calib, weight=1.0):
    """Vectorized plain-JAX replica of the PyTorch/NumPy reference loss."""
    B = gt_box2d.shape[0]
    ry = (reg_alphas + gt_theta_ray).reshape(B, 1)
    sx = jnp.array(_SX)[None, :]
    sy = jnp.array(_SY)[None, :]
    sz = jnp.array(_SZ)[None, :]
    X = reg_dims[:, 2:3] * 0.5 * sx
    Y = reg_dims[:, 0:1] * 0.5 * sy
    Z = reg_dims[:, 1:2] * 0.5 * sz
    c, s = jnp.cos(ry), jnp.sin(ry)
    Xw = c * X + s * Z + reg_loc[:, 0:1]
    Yw = Y + reg_loc[:, 1:2]
    Zw = -s * X + c * Z + reg_loc[:, 2:3]
    P = calib.reshape(B, 3, 4)
    u = P[:, 0, 0:1] * Xw + P[:, 0, 1:2] * Yw + P[:, 0, 2:3] * Zw + P[:, 0, 3:4]
    v = P[:, 1, 0:1] * Xw + P[:, 1, 1:2] * Yw + P[:, 1, 2:3] * Zw + P[:, 1, 3:4]
    w = P[:, 2, 0:1] * Xw + P[:, 2, 1:2] * Yw + P[:, 2, 2:3] * Zw + P[:, 2, 3:4]
    px = (u / w).astype(jnp.int32)
    py = (v / w).astype(jnp.int32)
    prj = jnp.stack([px.min(1), py.min(1), px.max(1), py.max(1)], axis=1)
    gt = gt_box2d.astype(jnp.int32)
    area1 = (gt[:, 2] - gt[:, 0]) * (gt[:, 3] - gt[:, 1])
    area2 = (prj[:, 2] - prj[:, 0]) * (prj[:, 3] - prj[:, 1])
    area_sum = jnp.abs(area1) + jnp.abs(area2)
    x1 = jnp.maximum(gt[:, 0], prj[:, 0])
    y1 = jnp.maximum(gt[:, 1], prj[:, 1])
    x2 = jnp.minimum(gt[:, 2], prj[:, 2])
    y2 = jnp.minimum(gt[:, 3], prj[:, 3])
    valid = jnp.logical_and(x1 < x2, y1 < y2)
    overlap = jnp.abs((x2 - x1) * (y2 - y1))
    union = area_sum - overlap
    iou = jnp.where(valid,
                    overlap.astype(jnp.float32) /
                    jnp.where(union == 0, 1, union).astype(jnp.float32),
                    0.0)
    return weight * jnp.mean(jnp.abs(1.0 - iou))


if __name__ == "__main__":
    key = jax.random.PRNGKey(0)
    B = 4
    k1, k2, k3, k4, k5, k6, k7 = jax.random.split(key, 7)

    # KITTI-like 3x4 camera projection matrix, shared across the batch.
    P = jnp.array([[721.54, 0.0, 609.56, 44.857],
                   [0.0, 721.54, 172.85, 0.2163],
                   [0.0, 0.0, 1.0, 0.00274]], jnp.float32)
    calib = jnp.tile(P[None], (B, 1, 1))                       # [B,3,4]

    # Ground-truth 3D boxes (dims = h,w,l ; loc = x,y,z in camera frame).
    gt_dims = (jnp.array([1.5, 1.6, 3.9], jnp.float32)[None, :]
               + 0.05 * jax.random.normal(k1, (B, 3)))
    gt_loc = jnp.stack([
        jax.random.uniform(k2, (B,), minval=-4.0, maxval=4.0),
        jnp.full((B,), 1.65, jnp.float32),
        jax.random.uniform(k3, (B,), minval=12.0, maxval=30.0),
    ], axis=1)
    gt_theta_ray = jax.random.uniform(k4, (B,), minval=-0.3, maxval=0.3)
    gt_alpha = jax.random.uniform(k5, (B,), minval=-1.2, maxval=1.2)
    gt_ry = gt_alpha + gt_theta_ray

    # gt_box2d synthesized by projecting the ground-truth 3D boxes.
    gt_box2d = jnp.stack(
        [_project_box2d_host(gt_ry[i], gt_loc[i], gt_dims[i], P)
         for i in range(B)], axis=0)                           # [B,4]

    # Regressed quantities = ground truth + small perturbations.
    reg_dims = gt_dims + 0.05 * jax.random.normal(k6, (B, 3))
    reg_alphas = gt_alpha + 0.05 * jax.random.normal(k7, (B,))
    # TODO(synk): stands in for calc_location(); see note at top of file.
    reg_loc = gt_loc + 0.1 * jax.random.normal(key, (B, 3))

    loss = iou_loss(gt_box2d, gt_theta_ray, reg_dims, reg_alphas, reg_loc,
                    calib, weight=1.0)
    loss = jax.block_until_ready(loss)

    ref = jax.block_until_ready(
        _iou_loss_ref(gt_box2d, gt_theta_ray, reg_dims, reg_alphas, reg_loc,
                      calib, weight=1.0))

    assert bool(jnp.isfinite(loss)), "loss is not finite"
    assert 0.0 <= float(loss) <= 1.0, "loss outside expected [0,1] range"
    assert abs(float(loss) - float(ref)) <= 1e-4 * max(1.0, abs(float(ref))), (
        f"kernel loss {float(loss)} != reference {float(ref)}")
    print("KERNEL_OK")
</pallas_src>

<mosaic_0001>
module attributes {stable_mosaic.version = 11 : i64} {
  func.func @_iou_loss_kernel(%arg0: i32, %arg1: memref<24x8x128xf32, #tpu.memory_space<vmem>>, %arg2: memref<1x128xf32, #tpu.memory_space<vmem>>) attributes {dimension_semantics = [#tpu.dimension_semantics<parallel>], iteration_bounds = array<i64: 1>, scalar_prefetch = 0 : i64, scratch_operands = 0 : i64, tpu.core_type = #tpu.core_type<tc>, window_params = [{transform_indices = @transform_0, window_bounds = array<i64: 24, 8, 128>}, {transform_indices = @transform_1, window_bounds = array<i64: 1, 128>}]} {
    %c0 = arith.constant 0 : index
    %c0_0 = arith.constant 0 : index
    %c0_1 = arith.constant 0 : index
    %0 = vector.load %arg1[%c0, %c0_0, %c0_1] : memref<24x8x128xf32, #tpu.memory_space<vmem>>, vector<24x8x128xf32>
    %1 = vector.extract_strided_slice %0 {offsets = [0, 0, 0], sizes = [1, 8, 128], strides = [1, 1, 1]} : vector<24x8x128xf32> to vector<1x8x128xf32>
    %2 = vector.shape_cast %1 : vector<1x8x128xf32> to vector<8x128xf32>
    %3 = arith.fptosi %2 : vector<8x128xf32> to vector<8x128xi32>
    %4 = arith.sitofp %3 : vector<8x128xi32> to vector<8x128xf32>
    %5 = vector.extract_strided_slice %0 {offsets = [1, 0, 0], sizes = [1, 8, 128], strides = [1, 1, 1]} : vector<24x8x128xf32> to vector<1x8x128xf32>
    %6 = vector.shape_cast %5 : vector<1x8x128xf32> to vector<8x128xf32>
    %7 = arith.fptosi %6 : vector<8x128xf32> to vector<8x128xi32>
    %8 = arith.sitofp %7 : vector<8x128xi32> to vector<8x128xf32>
    %9 = vector.extract_strided_slice %0 {offsets = [2, 0, 0], sizes = [1, 8, 128], strides = [1, 1, 1]} : vector<24x8x128xf32> to vector<1x8x128xf32>
    %10 = vector.shape_cast %9 : vector<1x8x128xf32> to vector<8x128xf32>
    %11 = arith.fptosi %10 : vector<8x128xf32> to vector<8x128xi32>
    %12 = arith.sitofp %11 : vector<8x128xi32> to vector<8x128xf32>
    %13 = vector.extract_strided_slice %0 {offsets = [3, 0, 0], sizes = [1, 8, 128], strides = [1, 1, 1]} : vector<24x8x128xf32> to vector<1x8x128xf32>
    %14 = vector.shape_cast %13 : vector<1x8x128xf32> to vector<8x128xf32>
    %15 = arith.fptosi %14 : vector<8x128xf32> to vector<8x128xi32>
    %16 = arith.sitofp %15 : vector<8x128xi32> to vector<8x128xf32>
    %17 = vector.extract_strided_slice %0 {offsets = [4, 0, 0], sizes = [1, 8, 128], strides = [1, 1, 1]} : vector<24x8x128xf32> to vector<1x8x128xf32>
    %18 = vector.shape_cast %17 : vector<1x8x128xf32> to vector<8x128xf32>
    %19 = vector.extract_strided_slice %0 {offsets = [5, 0, 0], sizes = [1, 8, 128], strides = [1, 1, 1]} : vector<24x8x128xf32> to vector<1x8x128xf32>
    %20 = vector.shape_cast %19 : vector<1x8x128xf32> to vector<8x128xf32>
    %21 = vector.extract_strided_slice %0 {offsets = [6, 0, 0], sizes = [1, 8, 128], strides = [1, 1, 1]} : vector<24x8x128xf32> to vector<1x8x128xf32>
    %22 = vector.shape_cast %21 : vector<1x8x128xf32> to vector<8x128xf32>
    %23 = vector.extract_strided_slice %0 {offsets = [7, 0, 0], sizes = [1, 8, 128], strides = [1, 1, 1]} : vector<24x8x128xf32> to vector<1x8x128xf32>
    %24 = vector.shape_cast %23 : vector<1x8x128xf32> to vector<8x128xf32>
    %25 = vector.extract_strided_slice %0 {offsets = [8, 0, 0], sizes = [1, 8, 128], strides = [1, 1, 1]} : vector<24x8x128xf32> to vector<1x8x128xf32>
    %26 = vector.shape_cast %25 : vector<1x8x128xf32> to vector<8x128xf32>
    %27 = vector.extract_strided_slice %0 {offsets = [9, 0, 0], sizes = [1, 8, 128], strides = [1, 1, 1]} : vector<24x8x128xf32> to vector<1x8x128xf32>
    %28 = vector.shape_cast %27 : vector<1x8x128xf32> to vector<8x128xf32>
    %29 = vector.extract_strided_slice %0 {offsets = [10, 0, 0], sizes = [1, 8, 128], strides = [1, 1, 1]} : vector<24x8x128xf32> to vector<1x8x128xf32>
    %30 = vector.shape_cast %29 : vector<1x8x128xf32> to vector<8x128xf32>
    %31 = vector.extract_strided_slice %0 {offsets = [11, 0, 0], sizes = [1, 8, 128], strides = [1, 1, 1]} : vector<24x8x128xf32> to vector<1x8x128xf32>
    %32 = vector.shape_cast %31 : vector<1x8x128xf32> to vector<8x128xf32>
    %33 = vector.extract_strided_slice %0 {offsets = [12, 0, 0], sizes = [1, 8, 128], strides = [1, 1, 1]} : vector<24x8x128xf32> to vector<1x8x128xf32>
    %34 = vector.shape_cast %33 : vector<1x8x128xf32> to vector<8x128xf32>
    %35 = vector.extract_strided_slice %0 {offsets = [13, 0, 0], sizes = [1, 8, 128], strides = [1, 1, 1]} : vector<24x8x128xf32> to vector<1x8x128xf32>
    %36 = vector.shape_cast %35 : vector<1x8x128xf32> to vector<8x128xf32>
    %37 = vector.extract_strided_slice %0 {offsets = [14, 0, 0], sizes = [1, 8, 128], strides = [1, 1, 1]} : vector<24x8x128xf32> to vector<1x8x128xf32>
    %38 = vector.shape_cast %37 : vector<1x8x128xf32> to vector<8x128xf32>
    %39 = vector.extract_strided_slice %0 {offsets = [15, 0, 0], sizes = [1, 8, 128], strides = [1, 1, 1]} : vector<24x8x128xf32> to vector<1x8x128xf32>
    %40 = vector.shape_cast %39 : vector<1x8x128xf32> to vector<8x128xf32>
    %41 = vector.extract_strided_slice %0 {offsets = [16, 0, 0], sizes = [1, 8, 128], strides = [1, 1, 1]} : vector<24x8x128xf32> to vector<1x8x128xf32>
    %42 = vector.shape_cast %41 : vector<1x8x128xf32> to vector<8x128xf32>
    %43 = vector.extract_strided_slice %0 {offsets = [17, 0, 0], sizes = [1, 8, 128], strides = [1, 1, 1]} : vector<24x8x128xf32> to vector<1x8x128xf32>
    %44 = vector.shape_cast %43 : vector<1x8x128xf32> to vector<8x128xf32>
    %45 = vector.extract_strided_slice %0 {offsets = [18, 0, 0], sizes = [1, 8, 128], strides = [1, 1, 1]} : vector<24x8x128xf32> to vector<1x8x128xf32>
    %46 = vector.shape_cast %45 : vector<1x8x128xf32> to vector<8x128xf32>
    %47 = vector.extract_strided_slice %0 {offsets = [19, 0, 0], sizes = [1, 8, 128], strides = [1, 1, 1]} : vector<24x8x128xf32> to vector<1x8x128xf32>
    %48 = vector.shape_cast %47 : vector<1x8x128xf32> to vector<8x128xf32>
    %49 = vector.extract_strided_slice %0 {offsets = [20, 0, 0], sizes = [1, 8, 128], strides = [1, 1, 1]} : vector<24x8x128xf32> to vector<1x8x128xf32>
    %50 = vector.shape_cast %49 : vector<1x8x128xf32> to vector<8x128xf32>
    %51 = vector.extract_strided_slice %0 {offsets = [21, 0, 0], sizes = [1, 8, 128], strides = [1, 1, 1]} : vector<24x8x128xf32> to vector<1x8x128xf32>
    %52 = vector.shape_cast %51 : vector<1x8x128xf32> to vector<8x128xf32>
    %53 = vector.extract_strided_slice %0 {offsets = [22, 0, 0], sizes = [1, 8, 128], strides = [1, 1, 1]} : vector<24x8x128xf32> to vector<1x8x128xf32>
    %54 = vector.shape_cast %53 : vector<1x8x128xf32> to vector<8x128xf32>
    %55 = vector.extract_strided_slice %0 {offsets = [23, 0, 0], sizes = [1, 8, 128], strides = [1, 1, 1]} : vector<24x8x128xf32> to vector<1x8x128xf32>
    %56 = vector.shape_cast %55 : vector<1x8x128xf32> to vector<8x128xf32>
    %57 = arith.addf %26, %18 : vector<8x128xf32>
    %58 = math.cos %57 : vector<8x128xf32>
    %59 = math.sin %57 : vector<8x128xf32>
    %cst = arith.constant 5.000000e-01 : f32
    %60 = vector.broadcast %cst : f32 to vector<8x128xf32>
    %61 = arith.mulf %24, %60 : vector<8x128xf32>
    %cst_2 = arith.constant 5.000000e-01 : f32
    %62 = vector.broadcast %cst_2 : f32 to vector<8x128xf32>
    %63 = arith.mulf %22, %62 : vector<8x128xf32>
    %cst_3 = arith.constant 5.000000e-01 : f32
    %64 = vector.broadcast %cst_3 : f32 to vector<8x128xf32>
    %65 = arith.mulf %20, %64 : vector<8x128xf32>
    %66 = arith.mulf %58, %61 : vector<8x128xf32>
    %67 = arith.mulf %59, %61 : vector<8x128xf32>
    %68 = arith.mulf %58, %63 : vector<8x128xf32>
    %69 = arith.mulf %59, %63 : vector<8x128xf32>
    %cst_4 = arith.constant 0.000000e+00 : f32
    %70 = vector.broadcast %cst_4 : f32 to vector<8x128xf32>
    %71 = arith.subf %70, %66 : vector<8x128xf32>
    %cst_5 = arith.constant 0.000000e+00 : f32
    %72 = vector.broadcast %cst_5 : f32 to vector<8x128xf32>
    %73 = arith.subf %72, %67 : vector<8x128xf32>
    %cst_6 = arith.constant 0.000000e+00 : f32
    %74 = vector.broadcast %cst_6 : f32 to vector<8x128xf32>
    %75 = arith.subf %74, %68 : vector<8x128xf32>
    %cst_7 = arith.constant 0.000000e+00 : f32
    %76 = vector.broadcast %cst_7 : f32 to vector<8x128xf32>
    %77 = arith.subf %76, %69 : vector<8x128xf32>
    %cst_8 = arith.constant 0.000000e+00 : f32
    %78 = vector.broadcast %cst_8 : f32 to vector<8x128xf32>
    %79 = arith.subf %78, %65 : vector<8x128xf32>
    %80 = arith.addf %66, %69 : vector<8x128xf32>
    %81 = arith.addf %80, %28 : vector<8x128xf32>
    %82 = arith.addf %65, %30 : vector<8x128xf32>
    %83 = arith.addf %73, %68 : vector<8x128xf32>
    %84 = arith.addf %83, %32 : vector<8x128xf32>
    %85 = arith.mulf %34, %81 : vector<8x128xf32>
    %86 = arith.mulf %36, %82 : vector<8x128xf32>
    %87 = arith.addf %85, %86 : vector<8x128xf32>
    %88 = arith.mulf %38, %84 : vector<8x128xf32>
    %89 = arith.addf %87, %88 : vector<8x128xf32>
    %90 = arith.addf %89, %40 : vector<8x128xf32>
    %91 = arith.mulf %42, %81 : vector<8x128xf32>
    %92 = arith.mulf %44, %82 : vector<8x128xf32>
    %93 = arith.addf %91, %92 : vector<8x128xf32>
    %94 = arith.mulf %46, %84 : vector<8x128xf32>
    %95 = arith.addf %93, %94 : vector<8x128xf32>
    %96 = arith.addf %95, %48 : vector<8x128xf32>
    %97 = arith.mulf %50, %81 : vector<8x128xf32>
    %98 = arith.mulf %52, %82 : vector<8x128xf32>
    %99 = arith.addf %97, %98 : vector<8x128xf32>
    %100 = arith.mulf %54, %84 : vector<8x128xf32>
    %101 = arith.addf %99, %100 : vector<8x128xf32>
    %102 = arith.addf %101, %56 : vector<8x128xf32>
    %cst_9 = arith.constant 1.000000e+00 : f32
    %103 = vector.broadcast %cst_9 : f32 to vector<8x128xf32>
    %104 = arith.divf %103, %102 : vector<8x128xf32>
    %105 = arith.mulf %90, %104 : vector<8x128xf32>
    %106 = arith.fptosi %105 : vector<8x128xf32> to vector<8x128xi32>
    %107 = arith.mulf %96, %104 : vector<8x128xf32>
    %108 = arith.fptosi %107 : vector<8x128xf32> to vector<8x128xi32>
    %109 = arith.addf %66, %77 : vector<8x128xf32>
    %110 = arith.addf %109, %28 : vector<8x128xf32>
    %111 = arith.addf %65, %30 : vector<8x128xf32>
    %112 = arith.addf %73, %75 : vector<8x128xf32>
    %113 = arith.addf %112, %32 : vector<8x128xf32>
    %114 = arith.mulf %34, %110 : vector<8x128xf32>
    %115 = arith.mulf %36, %111 : vector<8x128xf32>
    %116 = arith.addf %114, %115 : vector<8x128xf32>
    %117 = arith.mulf %38, %113 : vector<8x128xf32>
    %118 = arith.addf %116, %117 : vector<8x128xf32>
    %119 = arith.addf %118, %40 : vector<8x128xf32>
    %120 = arith.mulf %42, %110 : vector<8x128xf32>
    %121 = arith.mulf %44, %111 : vector<8x128xf32>
    %122 = arith.addf %120, %121 : vector<8x128xf32>
    %123 = arith.mulf %46, %113 : vector<8x128xf32>
    %124 = arith.addf %122, %123 : vector<8x128xf32>
    %125 = arith.addf %124, %48 : vector<8x128xf32>
    %126 = arith.mulf %50, %110 : vector<8x128xf32>
    %127 = arith.mulf %52, %111 : vector<8x128xf32>
    %128 = arith.addf %126, %127 : vector<8x128xf32>
    %129 = arith.mulf %54, %113 : vector<8x128xf32>
    %130 = arith.addf %128, %129 : vector<8x128xf32>
    %131 = arith.addf %130, %56 : vector<8x128xf32>
    %cst_10 = arith.constant 1.000000e+00 : f32
    %132 = vector.broadcast %cst_10 : f32 to vector<8x128xf32>
    %133 = arith.divf %132, %131 : vector<8x128xf32>
    %134 = arith.mulf %119, %133 : vector<8x128xf32>
    %135 = arith.fptosi %134 : vector<8x128xf32> to vector<8x128xi32>
    %136 = arith.mulf %125, %133 : vector<8x128xf32>
    %137 = arith.fptosi %136 : vector<8x128xf32> to vector<8x128xi32>
    %138 = arith.minsi %106, %135 : vector<8x128xi32>
    %139 = arith.maxsi %106, %135 : vector<8x128xi32>
    %140 = arith.minsi %108, %137 : vector<8x128xi32>
    %141 = arith.maxsi %108, %137 : vector<8x128xi32>
    %142 = arith.addf %66, %69 : vector<8x128xf32>
    %143 = arith.addf %142, %28 : vector<8x128xf32>
    %144 = arith.addf %79, %30 : vector<8x128xf32>
    %145 = arith.addf %73, %68 : vector<8x128xf32>
    %146 = arith.addf %145, %32 : vector<8x128xf32>
    %147 = arith.mulf %34, %143 : vector<8x128xf32>
    %148 = arith.mulf %36, %144 : vector<8x128xf32>
    %149 = arith.addf %147, %148 : vector<8x128xf32>
    %150 = arith.mulf %38, %146 : vector<8x128xf32>
    %151 = arith.addf %149, %150 : vector<8x128xf32>
    %152 = arith.addf %151, %40 : vector<8x128xf32>
    %153 = arith.mulf %42, %143 : vector<8x128xf32>
    %154 = arith.mulf %44, %144 : vector<8x128xf32>
    %155 = arith.addf %153, %154 : vector<8x128xf32>
    %156 = arith.mulf %46, %146 : vector<8x128xf32>
    %157 = arith.addf %155, %156 : vector<8x128xf32>
    %158 = arith.addf %157, %48 : vector<8x128xf32>
    %159 = arith.mulf %50, %143 : vector<8x128xf32>
    %160 = arith.mulf %52, %144 : vector<8x128xf32>
    %161 = arith.addf %159, %160 : vector<8x128xf32>
    %162 = arith.mulf %54, %146 : vector<8x128xf32>
    %163 = arith.addf %161, %162 : vector<8x128xf32>
    %164 = arith.addf %163, %56 : vector<8x128xf32>
    %cst_11 = arith.constant 1.000000e+00 : f32
    %165 = vector.broadcast %cst_11 : f32 to vector<8x128xf32>
    %166 = arith.divf %165, %164 : vector<8x128xf32>
    %167 = arith.mulf %152, %166 : vector<8x128xf32>
    %168 = arith.fptosi %167 : vector<8x128xf32> to vector<8x128xi32>
    %169 = arith.mulf %158, %166 : vector<8x128xf32>
    %170 = arith.fptosi %169 : vector<8x128xf32> to vector<8x128xi32>
    %171 = arith.minsi %138, %168 : vector<8x128xi32>
    %172 = arith.maxsi %139, %168 : vector<8x128xi32>
    %173 = arith.minsi %140, %170 : vector<8x128xi32>
    %174 = arith.maxsi %141, %170 : vector<8x128xi32>
    %175 = arith.addf %66, %77 : vector<8x128xf32>
    %176 = arith.addf %175, %28 : vector<8x128xf32>
    %177 = arith.addf %79, %30 : vector<8x128xf32>
    %178 = arith.addf %73, %75 : vector<8x128xf32>
    %179 = arith.addf %178, %32 : vector<8x128xf32>
    %180 = arith.mulf %34, %176 : vector<8x128xf32>
    %181 = arith.mulf %36, %177 : vector<8x128xf32>
    %182 = arith.addf %180, %181 : vector<8x128xf32>
    %183 = arith.mulf %38, %179 : vector<8x128xf32>
    %184 = arith.addf %182, %183 : vector<8x128xf32>
    %185 = arith.addf %184, %40 : vector<8x128xf32>
    %186 = arith.mulf %42, %176 : vector<8x128xf32>
    %187 = arith.mulf %44, %177 : vector<8x128xf32>
    %188 = arith.addf %186, %187 : vector<8x128xf32>
    %189 = arith.mulf %46, %179 : vector<8x128xf32>
    %190 = arith.addf %188, %189 : vector<8x128xf32>
    %191 = arith.addf %190, %48 : vector<8x128xf32>
    %192 = arith.mulf %50, %176 : vector<8x128xf32>
    %193 = arith.mulf %52, %177 : vector<8x128xf32>
    %194 = arith.addf %192, %193 : vector<8x128xf32>
    %195 = arith.mulf %54, %179 : vector<8x128xf32>
    %196 = arith.addf %194, %195 : vector<8x128xf32>
    %197 = arith.addf %196, %56 : vector<8x128xf32>
    %cst_12 = arith.constant 1.000000e+00 : f32
    %198 = vector.broadcast %cst_12 : f32 to vector<8x128xf32>
    %199 = arith.divf %198, %197 : vector<8x128xf32>
    %200 = arith.mulf %185, %199 : vector<8x128xf32>
    %201 = arith.fptosi %200 : vector<8x128xf32> to vector<8x128xi32>
    %202 = arith.mulf %191, %199 : vector<8x128xf32>
    %203 = arith.fptosi %202 : vector<8x128xf32> to vector<8x128xi32>
    %204 = arith.minsi %171, %201 : vector<8x128xi32>
    %205 = arith.maxsi %172, %201 : vector<8x128xi32>
    %206 = arith.minsi %173, %203 : vector<8x128xi32>
    %207 = arith.maxsi %174, %203 : vector<8x128xi32>
    %208 = arith.addf %71, %69 : vector<8x128xf32>
    %209 = arith.addf %208, %28 : vector<8x128xf32>
    %210 = arith.addf %65, %30 : vector<8x128xf32>
    %211 = arith.addf %67, %68 : vector<8x128xf32>
    %212 = arith.addf %211, %32 : vector<8x128xf32>
    %213 = arith.mulf %34, %209 : vector<8x128xf32>
    %214 = arith.mulf %36, %210 : vector<8x128xf32>
    %215 = arith.addf %213, %214 : vector<8x128xf32>
    %216 = arith.mulf %38, %212 : vector<8x128xf32>
    %217 = arith.addf %215, %216 : vector<8x128xf32>
    %218 = arith.addf %217, %40 : vector<8x128xf32>
    %219 = arith.mulf %42, %209 : vector<8x128xf32>
    %220 = arith.mulf %44, %210 : vector<8x128xf32>
    %221 = arith.addf %219, %220 : vector<8x128xf32>
    %222 = arith.mulf %46, %212 : vector<8x128xf32>
    %223 = arith.addf %221, %222 : vector<8x128xf32>
    %224 = arith.addf %223, %48 : vector<8x128xf32>
    %225 = arith.mulf %50, %209 : vector<8x128xf32>
    %226 = arith.mulf %52, %210 : vector<8x128xf32>
    %227 = arith.addf %225, %226 : vector<8x128xf32>
    %228 = arith.mulf %54, %212 : vector<8x128xf32>
    %229 = arith.addf %227, %228 : vector<8x128xf32>
    %230 = arith.addf %229, %56 : vector<8x128xf32>
    %cst_13 = arith.constant 1.000000e+00 : f32
    %231 = vector.broadcast %cst_13 : f32 to vector<8x128xf32>
    %232 = arith.divf %231, %230 : vector<8x128xf32>
    %233 = arith.mulf %218, %232 : vector<8x128xf32>
    %234 = arith.fptosi %233 : vector<8x128xf32> to vector<8x128xi32>
    %235 = arith.mulf %224, %232 : vector<8x128xf32>
    %236 = arith.fptosi %235 : vector<8x128xf32> to vector<8x128xi32>
    %237 = arith.minsi %204, %234 : vector<8x128xi32>
    %238 = arith.maxsi %205, %234 : vector<8x128xi32>
    %239 = arith.minsi %206, %236 : vector<8x128xi32>
    %240 = arith.maxsi %207, %236 : vector<8x128xi32>
    %241 = arith.addf %71, %77 : vector<8x128xf32>
    %242 = arith.addf %241, %28 : vector<8x128xf32>
    %243 = arith.addf %65, %30 : vector<8x128xf32>
    %244 = arith.addf %67, %75 : vector<8x128xf32>
    %245 = arith.addf %244, %32 : vector<8x128xf32>
    %246 = arith.mulf %34, %242 : vector<8x128xf32>
    %247 = arith.mulf %36, %243 : vector<8x128xf32>
    %248 = arith.addf %246, %247 : vector<8x128xf32>
    %249 = arith.mulf %38, %245 : vector<8x128xf32>
    %250 = arith.addf %248, %249 : vector<8x128xf32>
    %251 = arith.addf %250, %40 : vector<8x128xf32>
    %252 = arith.mulf %42, %242 : vector<8x128xf32>
    %253 = arith.mulf %44, %243 : vector<8x128xf32>
    %254 = arith.addf %252, %253 : vector<8x128xf32>
    %255 = arith.mulf %46, %245 : vector<8x128xf32>
    %256 = arith.addf %254, %255 : vector<8x128xf32>
    %257 = arith.addf %256, %48 : vector<8x128xf32>
    %258 = arith.mulf %50, %242 : vector<8x128xf32>
    %259 = arith.mulf %52, %243 : vector<8x128xf32>
    %260 = arith.addf %258, %259 : vector<8x128xf32>
    %261 = arith.mulf %54, %245 : vector<8x128xf32>
    %262 = arith.addf %260, %261 : vector<8x128xf32>
    %263 = arith.addf %262, %56 : vector<8x128xf32>
    %cst_14 = arith.constant 1.000000e+00 : f32
    %264 = vector.broadcast %cst_14 : f32 to vector<8x128xf32>
    %265 = arith.divf %264, %263 : vector<8x128xf32>
    %266 = arith.mulf %251, %265 : vector<8x128xf32>
    %267 = arith.fptosi %266 : vector<8x128xf32> to vector<8x128xi32>
    %268 = arith.mulf %257, %265 : vector<8x128xf32>
    %269 = arith.fptosi %268 : vector<8x128xf32> to vector<8x128xi32>
    %270 = arith.minsi %237, %267 : vector<8x128xi32>
    %271 = arith.maxsi %238, %267 : vector<8x128xi32>
    %272 = arith.minsi %239, %269 : vector<8x128xi32>
    %273 = arith.maxsi %240, %269 : vector<8x128xi32>
    %274 = arith.addf %71, %69 : vector<8x128xf32>
    %275 = arith.addf %274, %28 : vector<8x128xf32>
    %276 = arith.addf %79, %30 : vector<8x128xf32>
    %277 = arith.addf %67, %68 : vector<8x128xf32>
    %278 = arith.addf %277, %32 : vector<8x128xf32>
    %279 = arith.mulf %34, %275 : vector<8x128xf32>
    %280 = arith.mulf %36, %276 : vector<8x128xf32>
    %281 = arith.addf %279, %280 : vector<8x128xf32>
    %282 = arith.mulf %38, %278 : vector<8x128xf32>
    %283 = arith.addf %281, %282 : vector<8x128xf32>
    %284 = arith.addf %283, %40 : vector<8x128xf32>
    %285 = arith.mulf %42, %275 : vector<8x128xf32>
    %286 = arith.mulf %44, %276 : vector<8x128xf32>
    %287 = arith.addf %285, %286 : vector<8x128xf32>
    %288 = arith.mulf %46, %278 : vector<8x128xf32>
    %289 = arith.addf %287, %288 : vector<8x128xf32>
    %290 = arith.addf %289, %48 : vector<8x128xf32>
    %291 = arith.mulf %50, %275 : vector<8x128xf32>
    %292 = arith.mulf %52, %276 : vector<8x128xf32>
    %293 = arith.addf %291, %292 : vector<8x128xf32>
    %294 = arith.mulf %54, %278 : vector<8x128xf32>
    %295 = arith.addf %293, %294 : vector<8x128xf32>
    %296 = arith.addf %295, %56 : vector<8x128xf32>
    %cst_15 = arith.constant 1.000000e+00 : f32
    %297 = vector.broadcast %cst_15 : f32 to vector<8x128xf32>
    %298 = arith.divf %297, %296 : vector<8x128xf32>
    %299 = arith.mulf %284, %298 : vector<8x128xf32>
    %300 = arith.fptosi %299 : vector<8x128xf32> to vector<8x128xi32>
    %301 = arith.mulf %290, %298 : vector<8x128xf32>
    %302 = arith.fptosi %301 : vector<8x128xf32> to vector<8x128xi32>
    %303 = arith.minsi %270, %300 : vector<8x128xi32>
    %304 = arith.maxsi %271, %300 : vector<8x128xi32>
    %305 = arith.minsi %272, %302 : vector<8x128xi32>
    %306 = arith.maxsi %273, %302 : vector<8x128xi32>
    %307 = arith.addf %71, %77 : vector<8x128xf32>
    %308 = arith.addf %307, %28 : vector<8x128xf32>
    %309 = arith.addf %79, %30 : vector<8x128xf32>
    %310 = arith.addf %67, %75 : vector<8x128xf32>
    %311 = arith.addf %310, %32 : vector<8x128xf32>
    %312 = arith.mulf %34, %308 : vector<8x128xf32>
    %313 = arith.mulf %36, %309 : vector<8x128xf32>
    %314 = arith.addf %312, %313 : vector<8x128xf32>
    %315 = arith.mulf %38, %311 : vector<8x128xf32>
    %316 = arith.addf %314, %315 : vector<8x128xf32>
    %317 = arith.addf %316, %40 : vector<8x128xf32>
    %318 = arith.mulf %42, %308 : vector<8x128xf32>
    %319 = arith.mulf %44, %309 : vector<8x128xf32>
    %320 = arith.addf %318, %319 : vector<8x128xf32>
    %321 = arith.mulf %46, %311 : vector<8x128xf32>
    %322 = arith.addf %320, %321 : vector<8x128xf32>
    %323 = arith.addf %322, %48 : vector<8x128xf32>
    %324 = arith.mulf %50, %308 : vector<8x128xf32>
    %325 = arith.mulf %52, %309 : vector<8x128xf32>
    %326 = arith.addf %324, %325 : vector<8x128xf32>
    %327 = arith.mulf %54, %311 : vector<8x128xf32>
    %328 = arith.addf %326, %327 : vector<8x128xf32>
    %329 = arith.addf %328, %56 : vector<8x128xf32>
    %cst_16 = arith.constant 1.000000e+00 : f32
    %330 = vector.broadcast %cst_16 : f32 to vector<8x128xf32>
    %331 = arith.divf %330, %329 : vector<8x128xf32>
    %332 = arith.mulf %317, %331 : vector<8x128xf32>
    %333 = arith.fptosi %332 : vector<8x128xf32> to vector<8x128xi32>
    %334 = arith.mulf %323, %331 : vector<8x128xf32>
    %335 = arith.fptosi %334 : vector<8x128xf32> to vector<8x128xi32>
    %336 = arith.minsi %303, %333 : vector<8x128xi32>
    %337 = arith.maxsi %304, %333 : vector<8x128xi32>
    %338 = arith.minsi %305, %335 : vector<8x128xi32>
    %339 = arith.maxsi %306, %335 : vector<8x128xi32>
    %340 = arith.sitofp %336 : vector<8x128xi32> to vector<8x128xf32>
    %341 = arith.sitofp %338 : vector<8x128xi32> to vector<8x128xf32>
    %342 = arith.sitofp %337 : vector<8x128xi32> to vector<8x128xf32>
    %343 = arith.sitofp %339 : vector<8x128xi32> to vector<8x128xf32>
    %344 = arith.subf %12, %4 : vector<8x128xf32>
    %345 = arith.subf %16, %8 : vector<8x128xf32>
    %346 = arith.mulf %344, %345 : vector<8x128xf32>
    %347 = arith.subf %342, %340 : vector<8x128xf32>
    %348 = arith.subf %343, %341 : vector<8x128xf32>
    %349 = arith.mulf %347, %348 : vector<8x128xf32>
    %350 = math.absf %346 : vector<8x128xf32>
    %351 = math.absf %349 : vector<8x128xf32>
    %352 = arith.addf %350, %351 : vector<8x128xf32>
    %353 = arith.maximumf %4, %340 : vector<8x128xf32>
    %354 = arith.maximumf %8, %341 : vector<8x128xf32>
    %355 = arith.minimumf %12, %342 : vector<8x128xf32>
    %356 = arith.minimumf %16, %343 : vector<8x128xf32>
    %357 = arith.cmpf olt, %353, %355 : vector<8x128xf32>
    %358 = arith.cmpf olt, %354, %356 : vector<8x128xf32>
    %359 = arith.andi %357, %358 : vector<8x128xi1>
    %360 = arith.subf %355, %353 : vector<8x128xf32>
    %361 = arith.subf %356, %354 : vector<8x128xf32>
    %362 = arith.mulf %360, %361 : vector<8x128xf32>
    %363 = math.absf %362 : vector<8x128xf32>
    %364 = arith.subf %352, %363 : vector<8x128xf32>
    %cst_17 = arith.constant 0.000000e+00 : f32
    %365 = vector.broadcast %cst_17 : f32 to vector<8x128xf32>
    %366 = arith.cmpf oeq, %364, %365 : vector<8x128xf32>
    %cst_18 = arith.constant 1.000000e+00 : f32
    %367 = vector.broadcast %cst_18 : f32 to vector<8x128xf32>
    %368 = arith.select %366, %367, %364 : vector<8x128xi1>, vector<8x128xf32>
    %369 = arith.divf %363, %368 : vector<8x128xf32>
    %cst_19 = arith.constant 0.000000e+00 : f32
    %370 = vector.broadcast %cst_19 : f32 to vector<8x128xf32>
    %371 = arith.select %359, %369, %370 : vector<8x128xi1>, vector<8x128xf32>
    %372 = tpu.iota {dimensions = array<i32: 0>} : vector<8x128xi32>
    %373 = tpu.iota {dimensions = array<i32: 1>} : vector<8x128xi32>
    %c128_i32 = arith.constant 128 : i32
    %374 = vector.broadcast %c128_i32 : i32 to vector<8x128xi32>
    %375 = arith.muli %372, %374 : vector<8x128xi32>
    %c128_i32_20 = arith.constant 128 : i32
    %376 = arith.muli %arg0, %c128_i32_20 : i32
    %377 = vector.broadcast %376 : i32 to vector<8x128xi32>
    %378 = arith.addi %377, %373 : vector<8x128xi32>
    %379 = arith.addi %375, %378 : vector<8x128xi32>
    %c4_i32 = arith.constant 4 : i32
    %380 = vector.broadcast %c4_i32 : i32 to vector<8x128xi32>
    %381 = arith.cmpi slt, %379, %380 : vector<8x128xi32>
    %cst_21 = arith.constant 1.000000e+00 : f32
    %382 = vector.broadcast %cst_21 : f32 to vector<8x128xf32>
    %383 = arith.subf %382, %371 : vector<8x128xf32>
    %cst_22 = arith.constant 0.000000e+00 : f32
    %384 = vector.broadcast %cst_22 : f32 to vector<8x128xf32>
    %385 = arith.select %381, %383, %384 : vector<8x128xi1>, vector<8x128xf32>
    %cst_23 = arith.constant dense<0.000000e+00> : vector<128xf32>
    %386 = vector.multi_reduction <add>, %385, %cst_23 [0] : vector<8x128xf32> to vector<128xf32>
    %387 = vector.shape_cast %386 : vector<128xf32> to vector<1x128xf32>
    %c0_24 = arith.constant 0 : index
    %c0_25 = arith.constant 0 : index
    %388 = vector.load %arg2[%c0_24, %c0_25] : memref<1x128xf32, #tpu.memory_space<vmem>>, vector<1x128xf32>
    tpu.vector_store %arg2[%c0_24, %c0_25], %387 {strides = array<i32>} : memref<1x128xf32, #tpu.memory_space<vmem>>, vector<1x128xf32>,
    return
  }
  func.func @transform_0(%arg0: i32) -> (i32, i32, i32) {
    %c0_i32 = arith.constant 0 : i32
    %c0_i32_0 = arith.constant 0 : i32
    %c0_i32_1 = arith.constant 0 : i32
    return %c0_i32, %c0_i32_0, %arg0 : i32, i32, i32
  }
  func.func @transform_1(%arg0: i32) -> (i32, i32) {
    %c0_i32 = arith.constant 0 : i32
    %c0_i32_0 = arith.constant 0 : i32
    return %c0_i32, %arg0 : i32, i32
  }
}

</mosaic_0001>

<bundles_post_ra>
// kernel: iou_loss.1
= control target key start
LH: loop header
LB: loop body
LE: loop exit
PB: predicated region body
PF: predicated region fallthrough
CT: control target
= control target key end

     0   :  { %v617_v14 = vmov 683565275   ;;  %v618_v16 = vmov 2475754826   ;;  %v619_v18 = vmov 2131351028   ;;  %s894_s0 = inlined_call_operand.vmem [shape: f32[24,8,128], index: 0, kind: input, shape index: {}]   ;;  %s895_s1 = inlined_call_operand.vmem [shape: f32[1,128], index: 1, kind: output, shape index: {}]  }
   0x1   :  { %v12_v0 = vld [vmem:[%s894_s0 + $0x20] sm:$0xff]  ;;  %v620_v20 = vmov 2102212464   ;;  %v621_v22 = vmov 920167782  }
   0x2   :  { %v16_v1 = vld [vmem:[%s894_s0 + $0x40] sm:$0xff]  ;;  %v622_v29 = vmov 1326507024  }
   0x3   :  { %v639_v2 = vadd.f32 %v16_v1, %v12_v0 }
   0x5   :  { %v44_v3 = vand.u32 2139095040, %v639_v2  ;;  %v41_v5 = vand.u32 2147483647, %v639_v2  ;;  %vm43_vm7 = vcmp.lt.s32.totalorder %v639_v2, 0  ;;  %vm133_vm15 = vweird.f32 %v639_v2 }
   0x7   :  { %v45_v4 = vshrl.u32 %v44_v3, 23  ;;  %v48_v8 = vand.u32 8388607, %v41_v5  ;;  %vm42_vm8 = vcmp.le.f32.partialorder %v41_v5, 0.7853982 }
   0x9   :  { %v537_v6 = vadd.s32 4294967169, %v45_v4  ;;  %v49_v11 = vor.u32 8388608, %v48_v8 }
   0xb   :  { %v51_v7 = vadd.s32 1, %v537_v6  ;;  %v89_v31 = vshll.u32 %v49_v11, 8 }
   0xd   :  { %vm52_vm0 = vcmp.gt.s32.totalorder %v51_v7, 0 }
   0xe   :  { %v53_v9 = vsel %vm52_vm0, %v51_v7, 0 }
   0xf   :  { %v55_v10 = vand.u32 31, %v53_v9  ;;  %v54_v12 = vshrl.u32 %v53_v9, 5 }
  0x11   :  { %v56_v13 = vsub.s32 32, %v55_v10  ;;  %v58_v15 = vshll.u32 %v617_v14, %v55_v10  ;;  %v61_v17 = vshll.u32 %v618_v16, %v55_v10  ;;  %v64_v19 = vshll.u32 %v619_v18, %v55_v10 }
  0x12   :  { %v67_v21 = vshll.u32 %v620_v20, %v55_v10  ;;  %v70_v23 = vshll.u32 %v621_v22, %v55_v10  ;;  %vm73_vm1 = vcmp.lt.s32.totalorder %v54_v12, 1  ;;  %vm76_vm2 = vcmp.lt.s32.totalorder %v54_v12, 4 }
  0x13   :  { %v57_v24 = vshrl.u32 %v617_v14, %v56_v13  ;;  %v59_v25 = vshrl.u32 %v618_v16, %v56_v13  ;;  %v62_v26 = vshrl.u32 %v619_v18, %v56_v13  ;;  %v65_v27 = vshrl.u32 %v620_v20, %v56_v13 }
  0x14   :  { %v68_v28 = vshrl.u32 %v621_v22, %v56_v13  ;;  %v71_v30 = vshrl.u32 %v622_v29, %v56_v13  ;;  %vm74_vm3 = vcmp.lt.s32.totalorder %v54_v12, 2  ;;  %vm75_vm4 = vcmp.lt.s32.totalorder %v54_v12, 3 }
  0x15   :  { %v60_v32 = vor.u32 %v59_v25, %v58_v15  ;;  %v63_v33 = vor.u32 %v62_v26, %v61_v17  ;;  %v66_v34 = vor.u32 %v65_v27, %v64_v19  ;;  %v13_v25 = vld [vmem:[%s894_s0 + $0x28] sm:$0xff]  ;;  %v15_v26 = vld [vmem:[%s894_s0 + $0x38] sm:$0xff]  ;;  %v14_v27 = vld [vmem:[%s894_s0 + $0x30] sm:$0xff] }
  0x16   :  { %v69_v35 = vor.u32 %v68_v28, %v67_v21  ;;  %v72_v36 = vor.u32 %v71_v30, %v70_v23  ;;  %v250_v28 = vmul.f32 0.5, %v13_v25 }
  0x17   :  { %v77_v37 = vsel %vm73_vm1, %v57_v24, %v60_v32  ;;  %v78_v38 = vsel %vm76_vm2, %v66_v34, 2102212464  ;;  %v81_v39 = vsel %vm73_vm1, %v60_v32, %v63_v33  ;;  %v85_v40 = vsel %vm73_vm1, %v63_v33, %v66_v34 }
  0x18   :  { %v79_v41 = vsel %vm75_vm4, %v63_v33, %v78_v38  ;;  %v82_v42 = vsel %vm76_vm2, %v69_v35, 920167782  ;;  %v86_v43 = vsel %vm76_vm2, %v72_v36, 1326507024  ;;  %v248_v32 = vmul.f32 0.5, %v15_v26  ;;  %v18_v33 = vld [vmem:[%s894_s0 + $0x50] sm:$0xff] }
  0x19   :  { %v83_v44 = vsel %vm75_vm4, %v66_v34, %v82_v42  ;;  %v87_v45 = vsel %vm75_vm4, %v69_v35, %v86_v43  ;;  %v80_v46 = vsel %vm74_vm3, %v77_v37, %v79_v41  ;;  %v249_v36 = vmul.f32 0.5, %v14_v27 }
  0x1a   :  { %v84_v47 = vsel %vm74_vm3, %v81_v39, %v83_v44  ;;  %v88_v48 = vsel %vm74_vm3, %v85_v40, %v87_v45  ;;  %v96_v53 = vmul.u32 %v89_v31, %v80_v46  ;;  %v259_v39 = vsub.f32 0.0, %v250_v28  ;;  %v21_v45 = vld [vmem:[%s894_s0 + $0x68] sm:$0xff] }
  0x1b   :  { %v645_v49 = vmul.u32.u64.low %v89_v31, %v88_v48  ;;  %v646_v50 = vmul.u32.u64.high %v89_v31, %v88_v48, %v645_v49  ;;  %v648_v51 = vmul.u32.u64.low %v89_v31, %v84_v47  ;;  %v649_v52 = vmul.u32.u64.high %v89_v31, %v84_v47, %v648_v51  ;;  %v25_v46 = vld [vmem:[%s894_s0 + $0x88] sm:$0xff] }
  0x1c   :  { %v262_v44 = vadd.f32 %v250_v28, %v18_v33  ;;  %v765_v28 = vld [vmem:[%s894_s0 + $0xb8] sm:$0xff] }
  0x1d   :  { %vm98_vm5 = vc.u32 %v646_v50, %v648_v51  ;;  %v99_v54 = vadd.s32 1, %v649_v52  ;;  %v97_v1 = vadd.s32 %v648_v51, %v646_v50  ;;  %v29_v50 = vld [vmem:[%s894_s0 + $0xa8] sm:$0xff]  ;;  %v322_v51 = vadd.f32 %v259_v39, %v18_v33 }
  0x1f   :  { %v100_v55 = vsel %vm98_vm5, %v99_v54, %v649_v52  ;;  %v690_v52 = vld [vmem:[%s894_s0 + $0x48] sm:$0xff] }
  0x20   :  { %v101_v56 = vadd.s32 %v100_v55, %v96_v53 }
  0x22   :  { %v102_v57 = vadd.s32 536870912, %v101_v56 }
  0x24   :  { %v103_v58 = vshrl.u32 %v102_v57, 30  ;;  %v698_v57 = vld [vmem:[%s894_s0 + $0x58] sm:$0xff] }
  0x26   :  { %v104_v59 = vshll.u32 %v103_v58, 30  ;;  %v127_v15 = vsub.s32 4, %v103_v58 }
  0x28   :  { %v105_v60 = vsub.s32 %v101_v56, %v104_v59  ;;  %v128_v18 = vsel %vm43_vm7, %v127_v15, %v103_v58  ;;  %v701_v59 = vmul.f32 %v262_v44, %v21_v45 }
  0x29   :  { %v130_v21 = vsel %vm42_vm8, 0, %v128_v18 }
  0x2a   :  { %v107_v61 = vsub.s32 0, %v105_v60  ;;  %v237_v22 = vadd.s32 3, %v130_v21  ;;  %v134_v23 = vand.u32 3, %v130_v21 }
  0x2c   :  { %v538_v62 = vmin.u32 %v107_v61, %v105_v60  ;;  %v238_v24 = vand.u32 3, %v237_v22  ;;  %vm139_vm9 = vcmp.eq.s32.totalorder %v134_v23, 2  ;;  %vm136_vm11 = vcmp.eq.s32.totalorder %v134_v23, 0  ;;  %v708_v61 = vld [vmem:[%s894_s0 + $0x60] sm:$0xff] }
  0x2d   :  { %vm135_vm13 = vcmp.lt.s32.totalorder %v134_v23, 2 }
  0x2e   :  { %v109_v63 = vclz %v538_v62  ;;  %vm243_vm10 = vcmp.eq.s32.totalorder %v238_v24, 2  ;;  %vm240_vm12 = vcmp.eq.s32.totalorder %v238_v24, 0  ;;  %vm239_vm14 = vcmp.lt.s32.totalorder %v238_v24, 2  ;;  %v713_v62 = vld [vmem:[%s894_s0 + $0x80] sm:$0xff] }
  0x30   :  { %v539_v0 = vadd.s32 4294967294, %v109_v63  ;;  %v718_v63 = vld [vmem:[%s894_s0 + $0xa0] sm:$0xff] }
  0x32   :  { %vm540_vm6 = vcmp.lt.s32.totalorder %v539_v0, 0 }
  0x33   :  { %v112_v3 = vsel %vm540_vm6, 0, %v539_v0 }
  0x34   :  { %v113_v4 = vsub.s32 32, %v112_v3  ;;  %v114_v6 = vshll.u32 %v105_v60, %v112_v3  ;;  %v117_v7 = vsub.s32 4294967266, %v112_v3  ;;  %v703_v60 = vmul.f32 %v262_v44, %v25_v46 }
  0x36   :  { %v115_v8 = vshrl.u32 %v97_v1, %v113_v4  ;;  %v118_v9 = vadd.s32 127, %v117_v7  ;;  %v721_v1 = vmul.f32 %v262_v44, %v29_v50  ;;  %v732_v7 = vld [vmem:[%s894_s0 + $0x90] sm:$0xff] }
  0x38   :  { %v116_v10 = vor.u32 %v115_v8, %v114_v6  ;;  %v119_v11 = vshll.u32 %v118_v9, 23  ;;  %v727_v6 = vld [vmem:[%s894_s0 + $0x70] sm:$0xff] }
  0x39   :  { %v737_v8 = vld [vmem:[%s894_s0 + $0xb0] sm:$0xff] }
  0x3a   :  { %v120_v12 = vor.u32 4788187, %v119_v11  ;;  %v123_v13 = vcvt.s32.f32 %v116_v10  ;;  %v740_v10 = vmul.f32 %v322_v51, %v21_v45  ;;  %v742_v11 = vmul.f32 %v322_v51, %v25_v46 }
  0x3c   :  { %v121_v14 = vand.u32 2147483647, %v120_v12  ;;  %v744_v12 = vmul.f32 %v322_v51, %v29_v50 }
  0x3e   :  { %v124_v16 = vmul.f32 %v123_v13, %v121_v14 }
  0x40   :  { %v125_v17 = vxor.u32 2147483648, %v124_v16 }
  0x42   :  { %v126_v19 = vsel %vm43_vm7, %v125_v17, %v124_v16 }
  0x43   :  { %v129_v20 = vsel %vm42_vm8, %v639_v2, %v126_v19 }
  0x44   :  { %595 = vcosq.f32 %v129_v20 }
  0x45   :  { %597 = vsinq.f32 %v129_v20 }
  0x4e   :  { %v596_v5 = vpop.eup %595 }
  0x4f   :  { %v598_v29 = vpop.eup %597  ;;  %v140_v30 = vxor.u32 2147483648, %v596_v5 }
  0x50   :  { %v137_v31 = vxor.u32 2147483648, %v598_v29 }
  0x51   :  { %v141_v34 = vsel %vm139_vm9, %v140_v30, %v598_v29  ;;  %v245_v35 = vsel %vm243_vm10, %v140_v30, %v598_v29 }
  0x52   :  { %v138_v37 = vsel %vm136_vm11, %v596_v5, %v137_v31  ;;  %v242_v38 = vsel %vm240_vm12, %v596_v5, %v137_v31 }
  0x53   :  { %v142_v40 = vsel %vm135_vm13, %v138_v37, %v141_v34  ;;  %v246_v41 = vsel %vm239_vm14, %v242_v38, %v245_v35 }
  0x54   :  { %v143_v42 = vsel %vm133_vm15, nan, %v142_v40  ;;  %v247_v43 = vsel %vm133_vm15, nan, %v246_v41  ;;  %v778_v41 = vld [vmem:[%s894_s0 + $0x78] sm:$0xff] }
  0x55   :  { %v678_v2 = vmul.f32 %v248_v32, %v143_v42  ;;  %v680_v47 = vmul.f32 %v248_v32, %v247_v43  ;;  %v682_v48 = vmul.f32 %v249_v36, %v143_v42  ;;  %v254_v49 = vmul.f32 %v249_v36, %v247_v43  ;;  %v783_v42 = vld [vmem:[%s894_s0 + $0x98] sm:$0xff] }
  0x57   :  { %v255_v53 = vsub.f32 0.0, %v678_v2  ;;  %v256_v54 = vsub.f32 0.0, %v680_v47  ;;  %v257_v55 = vsub.f32 0.0, %v682_v48  ;;  %v258_v56 = vsub.f32 0.0, %v254_v49 }
  0x58   :  { %v260_v58 = vadd.f32 %v254_v49, %v678_v2  ;;  %v374_v16 = vadd.f32 %v682_v48, %v680_v47 }
  0x59   :  { %v263_v0 = vadd.f32 %v256_v54, %v682_v48  ;;  %v289_v3 = vadd.f32 %v258_v56, %v678_v2  ;;  %v291_v4 = vadd.f32 %v257_v55, %v256_v54  ;;  %v372_v15 = vadd.f32 %v255_v53, %v254_v49 }
  0x5a   :  { %v261_v9 = vadd.f32 %v260_v58, %v690_v52  ;;  %v375_v32 = vadd.f32 %v374_v16, %v698_v57  ;;  %v405_v45 = vadd.f32 %v258_v56, %v255_v53  ;;  %v407_v49 = vadd.f32 %v257_v55, %v680_v47 }
  0x5b   :  { %v264_v13 = vadd.f32 %v263_v0, %v698_v57  ;;  %v290_v14 = vadd.f32 %v289_v3, %v690_v52  ;;  %v292_v20 = vadd.f32 %v291_v4, %v698_v57  ;;  %v373_v2 = vadd.f32 %v372_v15, %v690_v52 }
  0x5c   :  { %v265_v17 = vmul.f32 %v261_v9, %v708_v61  ;;  %v271_v18 = vmul.f32 %v261_v9, %v713_v62  ;;  %v277_v19 = vmul.f32 %v261_v9, %v718_v63  ;;  %v789_v48 = vmul.f32 %v375_v32, %v727_v6 }
  0x5d   :  { %v268_v21 = vmul.f32 %v264_v13, %v727_v6  ;;  %v274_v22 = vmul.f32 %v264_v13, %v732_v7  ;;  %v280_v23 = vmul.f32 %v264_v13, %v737_v8  ;;  %v293_v24 = vmul.f32 %v290_v14, %v708_v61 }
  0x5e   :  { %v267_v25 = vadd.f32 %v701_v59, %v265_v17  ;;  %v273_v26 = vadd.f32 %v703_v60, %v271_v18  ;;  %v279_v5 = vadd.f32 %v721_v1, %v277_v19  ;;  %v295_v27 = vmul.f32 %v292_v20, %v727_v6 }
  0x5f   :  { %v294_v29 = vadd.f32 %v293_v24, %v701_v59  ;;  %v298_v30 = vmul.f32 %v290_v14, %v713_v62  ;;  %v303_v31 = vmul.f32 %v290_v14, %v718_v63  ;;  %v300_v35 = vmul.f32 %v292_v20, %v732_v7 }
  0x60   :  { %v269_v33 = vadd.f32 %v268_v21, %v267_v25  ;;  %v281_v34 = vadd.f32 %v280_v23, %v279_v5  ;;  %v305_v36 = vmul.f32 %v292_v20, %v737_v8  ;;  %v275_v37 = vadd.f32 %v274_v22, %v273_v26 }
  0x61   :  { %v296_v38 = vadd.f32 %v295_v27, %v294_v29  ;;  %v299_v39 = vadd.f32 %v298_v30, %v703_v60  ;;  %v304_v40 = vadd.f32 %v303_v31, %v721_v1  ;;  %v324_v44 = vadd.f32 %v740_v10, %v265_v17 }
  0x62   :  { %v282_v43 = vadd.f32 %v281_v34, %v765_v28  ;;  %v328_v51 = vadd.f32 %v742_v11, %v271_v18  ;;  %v332_v54 = vadd.f32 %v744_v12, %v277_v19  ;;  %v270_v58 = vadd.f32 %v269_v33, %v778_v41 }
  0x63   :  { %v306_v46 = vadd.f32 %v305_v36, %v304_v40  ;;  %v301_v50 = vadd.f32 %v300_v35, %v299_v39  ;;  %v276_v0 = vadd.f32 %v275_v37, %v783_v42  ;;  %v297_v53 = vadd.f32 %v296_v38, %v778_v41 }
  0x64   :  { %599 = vrcp.f32 %v282_v43  ;;  %v325_v3 = vadd.f32 %v324_v44, %v268_v21  ;;  %v333_v4 = vadd.f32 %v332_v54, %v280_v23  ;;  %v349_v9 = vadd.f32 %v740_v10, %v293_v24 }
  0x65   :  { %v307_v56 = vadd.f32 %v306_v46, %v765_v28  ;;  %v355_v47 = vadd.f32 %v744_v12, %v303_v31  ;;  %v352_v55 = vadd.f32 %v742_v11, %v298_v30  ;;  %v376_v13 = vmul.f32 %v373_v2, %v708_v61 }
  0x66   :  { %v803_v14 = vmul.f32 %v373_v2, %v713_v62  ;;  %v302_v15 = vadd.f32 %v301_v50, %v783_v42  ;;  %v329_v16 = vadd.f32 %v328_v51, %v274_v22  ;;  %v334_v17 = vadd.f32 %v333_v4, %v765_v28 }
  0x67   :  { %601 = vrcp.f32 %v307_v56  ;;  %v356_v18 = vadd.f32 %v355_v47, %v305_v36  ;;  %v377_v19 = vadd.f32 %v376_v13, %v701_v59  ;;  %v811_v21 = vmul.f32 %v375_v32, %v732_v7 }
  0x68   :  { %v382_v20 = vadd.f32 %v803_v14, %v703_v60  ;;  %v386_v23 = vmul.f32 %v373_v2, %v718_v63  ;;  %603 = vrcp.f32 %v334_v17  ;;  %v388_v25 = vmul.f32 %v375_v32, %v737_v8 }
  0x69   :  { %v357_v24 = vadd.f32 %v356_v18, %v765_v28  ;;  %v406_v22 = vadd.f32 %v405_v45, %v690_v52  ;;  %v350_v26 = vadd.f32 %v349_v9, %v295_v27  ;;  %v353_v5 = vadd.f32 %v352_v55, %v300_v35 }
  0x6a   :  { %v387_v29 = vadd.f32 %v386_v23, %v721_v1  ;;  %v408_v30 = vadd.f32 %v407_v49, %v698_v57  ;;  %v379_v32 = vadd.f32 %v789_v48, %v377_v19  ;;  %v384_v52 = vadd.f32 %v811_v21, %v382_v20 }
  0x6b   :  { %605 = vrcp.f32 %v357_v24  ;;  %v820_v31 = vmul.f32 %v406_v22, %v708_v61  ;;  %v823_v33 = vmul.f32 %v406_v22, %v713_v62  ;;  %v826_v34 = vmul.f32 %v406_v22, %v718_v63 }
  0x6c   :  { %v389_v27 = vadd.f32 %v388_v25, %v387_v29  ;;  %v831_v35 = vmul.f32 %v408_v30, %v727_v6  ;;  %v838_v62 = vmul.f32 %v408_v30, %v732_v7  ;;  %v844_v6 = vmul.f32 %v408_v30, %v737_v8 }
  0x6d   :  { %v410_v57 = vadd.f32 %v820_v31, %v701_v59  ;;  %v415_v61 = vadd.f32 %v823_v33, %v703_v60  ;;  %v420_v63 = vadd.f32 %v826_v34, %v721_v1  ;;  %v326_v40 = vadd.f32 %v325_v3, %v778_v41 }
  0x6e   :  { %v600_v36 = vpop.eup %599  ;;  %v390_v39 = vadd.f32 %v389_v27, %v765_v28  ;;  %v330_v59 = vadd.f32 %v329_v16, %v783_v42  ;;  %v351_v43 = vadd.f32 %v350_v26, %v778_v41  ;;  %v354_v60 = vadd.f32 %v353_v5, %v783_v42 }
  0x6f   :  { %v285_v37 = vmul.f32 %v600_v36, %v270_v58  ;;  %v287_v38 = vmul.f32 %v600_v36, %v276_v0  ;;  %v422_v1 = vadd.f32 %v844_v6, %v420_v63  ;;  %v380_v49 = vadd.f32 %v379_v32, %v778_v41  ;;  %v8_v63 = vld [vmem:[%s894_s0] sm:$0xff] }
  0x70   :  { %607 = vrcp.f32 %v390_v39  ;;  %v385_v8 = vadd.f32 %v384_v52, %v783_v42  ;;  %v412_v51 = vadd.f32 %v831_v35, %v410_v57  ;;  %v417_v54 = vadd.f32 %v838_v62, %v415_v61 }
  0x71   :  { %v602_v7 = vpop.eup %601  ;;  %v557_v44 = vtrunc.f32 %v285_v37  ;;  %v559_v45 = vtrunc.f32 %v287_v38  ;;  %v423_v58 = vadd.f32 %v422_v1, %v765_v28  ;;  %v444_v9 = vadd.f32 %v386_v23, %v744_v12 }
  0x72   :  { %v310_v46 = vmul.f32 %v602_v7, %v297_v53  ;;  %v312_v2 = vmul.f32 %v602_v7, %v302_v15  ;;  %v604_v0 = vpop.eup %603  ;;  %v438_v55 = vadd.f32 %v376_v13, %v740_v10  ;;  %v441_v18 = vadd.f32 %v803_v14, %v742_v11 }
  0x73   :  { %v558_v50 = vcvt.f32.s32 %v557_v44  ;;  %v560_v56 = vcvt.f32.s32 %v559_v45  ;;  %v337_v47 = vmul.f32 %v604_v0, %v326_v40  ;;  %v339_v53 = vmul.f32 %v604_v0, %v330_v59 }
  0x74   :  { %v561_v3 = vtrunc.f32 %v310_v46  ;;  %v563_v4 = vtrunc.f32 %v312_v2  ;;  %609 = vrcp.f32 %v423_v58  ;;  %v445_v19 = vadd.f32 %v444_v9, %v388_v25 }
  0x75   :  { %v606_v15 = vpop.eup %605  ;;  %v565_v20 = vtrunc.f32 %v337_v47  ;;  %v567_v24 = vtrunc.f32 %v339_v53  ;;  %v413_v14 = vadd.f32 %v412_v51, %v778_v41  ;;  %v418_v25 = vadd.f32 %v417_v54, %v783_v42 }
  0x76   :  { %v562_v16 = vcvt.f32.s32 %v561_v3  ;;  %v564_v17 = vcvt.f32.s32 %v563_v4  ;;  %v360_v22 = vmul.f32 %v606_v15, %v351_v43  ;;  %v362_v26 = vmul.f32 %v606_v15, %v354_v60 }
  0x77   :  { %v566_v13 = vcvt.f32.s32 %v565_v20  ;;  %v568_v32 = vcvt.f32.s32 %v567_v24  ;;  %v446_v57 = vadd.f32 %v445_v19, %v765_v28  ;;  %v467_v61 = vadd.f32 %v826_v34, %v744_v12 }
  0x78   :  { %vm314_vm0 = vcmp.lt.s32.totalorder %v558_v50, %v562_v16  ;;  %vm316_vm1 = vcmp.gt.s32.totalorder %v558_v50, %v562_v16  ;;  %vm318_vm2 = vcmp.lt.s32.totalorder %v560_v56, %v564_v17  ;;  %vm320_vm3 = vcmp.gt.s32.totalorder %v560_v56, %v564_v17 }
  0x79   :  { %v315_v23 = vsel %vm314_vm0, %v558_v50, %v562_v16  ;;  %v317_v5 = vsel %vm316_vm1, %v558_v50, %v562_v16  ;;  %v319_v29 = vsel %vm318_vm2, %v560_v56, %v564_v17  ;;  %v321_v30 = vsel %vm320_vm3, %v560_v56, %v564_v17 }
  0x7a   :  { %v569_v52 = vtrunc.f32 %v360_v22  ;;  %v571_v27 = vtrunc.f32 %v362_v26  ;;  %v608_v36 = vpop.eup %607  ;;  %vm341_vm4 = vcmp.lt.s32.totalorder %v315_v23, %v566_v13  ;;  %vm343_vm5 = vcmp.gt.s32.totalorder %v317_v5, %v566_v13 }
  0x7b   :  { %vm345_vm6 = vcmp.lt.s32.totalorder %v319_v29, %v568_v32  ;;  %vm347_vm7 = vcmp.gt.s32.totalorder %v321_v30, %v568_v32  ;;  %v342_v37 = vsel %vm341_vm4, %v315_v23, %v566_v13  ;;  %v344_v38 = vsel %vm343_vm5, %v317_v5, %v566_v13 }
  0x7c   :  { %v346_v39 = vsel %vm345_vm6, %v319_v29, %v568_v32  ;;  %v348_v40 = vsel %vm347_vm7, %v321_v30, %v568_v32  ;;  %v570_v59 = vcvt.f32.s32 %v569_v52  ;;  %v572_v43 = vcvt.f32.s32 %v571_v27 }
  0x7d   :  { %v393_v60 = vmul.f32 %v608_v36, %v380_v49  ;;  %v395_v7 = vmul.f32 %v608_v36, %v385_v8  ;;  %v545_v45 = vtrunc.f32 %v8_v63  ;;  %v439_v12 = vadd.f32 %v438_v55, %v789_v48  ;;  %v9_v48 = vld [vmem:[%s894_s0 + $0x8] sm:$0xff]  ;;  %v11_v8 = vld [vmem:[%s894_s0 + $0x18] sm:$0xff] }
  0x7e   :  { %v610_v44 = vpop.eup %609  ;;  %611 = vrcp.f32 %v446_v57  ;;  %v468_v34 = vadd.f32 %v467_v61, %v844_v6  ;;  %vm364_vm8 = vcmp.lt.s32.totalorder %v342_v37, %v570_v59  ;;  %vm366_vm9 = vcmp.gt.s32.totalorder %v344_v38, %v570_v59  ;;  %v10_v6 = vld [vmem:[%s894_s0 + $0x10] sm:$0xff] }
  0x7f   :  { %vm368_vm10 = vcmp.lt.s32.totalorder %v346_v39, %v572_v43  ;;  %vm370_vm11 = vcmp.gt.s32.totalorder %v348_v40, %v572_v43  ;;  %v365_v1 = vsel %vm364_vm8, %v342_v37, %v570_v59  ;;  %v442_v46 = vadd.f32 %v441_v18, %v811_v21 }
  0x80   :  { %v461_v2 = vadd.f32 %v820_v31, %v740_v10  ;;  %v464_v49 = vadd.f32 %v823_v33, %v742_v11  ;;  %v573_v50 = vtrunc.f32 %v393_v60  ;;  %v575_v21 = vtrunc.f32 %v395_v7 }
  0x81   :  { %v426_v51 = vmul.f32 %v610_v44, %v413_v14  ;;  %v428_v54 = vmul.f32 %v610_v44, %v418_v25  ;;  %v367_v10 = vsel %vm366_vm9, %v344_v38, %v570_v59  ;;  %v369_v31 = vsel %vm368_vm10, %v346_v39, %v572_v43 }
  0x82   :  { %v371_v58 = vsel %vm370_vm11, %v348_v40, %v572_v43  ;;  %v469_v11 = vadd.f32 %v468_v34, %v765_v28  ;;  %v574_v33 = vcvt.f32.s32 %v573_v50  ;;  %v576_v0 = vcvt.f32.s32 %v575_v21 }
  0x83   :  { %v577_v56 = vtrunc.f32 %v426_v51  ;;  %v579_v3 = vtrunc.f32 %v428_v54  ;;  %v547_v4 = vtrunc.f32 %v9_v48  ;;  %v549_v9 = vtrunc.f32 %v10_v6 }
  0x84   :  { %v551_v47 = vtrunc.f32 %v11_v8  ;;  %613 = vrcp.f32 %v469_v11  ;;  %vm397_vm12 = vcmp.lt.s32.totalorder %v365_v1, %v574_v33  ;;  %vm399_vm13 = vcmp.gt.s32.totalorder %v367_v10, %v574_v33 }
  0x85   :  { %vm401_vm14 = vcmp.lt.s32.totalorder %v369_v31, %v576_v0  ;;  %vm403_vm15 = vcmp.gt.s32.totalorder %v371_v58, %v576_v0  ;;  %v440_v53 = vadd.f32 %v439_v12, %v778_v41  ;;  %v443_v55 = vadd.f32 %v442_v46, %v783_v42 }
  0x86   :  { %v462_v15 = vadd.f32 %v461_v2, %v831_v35  ;;  %v465_v28 = vadd.f32 %v464_v49, %v838_v62  ;;  %v398_v16 = vsel %vm397_vm12, %v365_v1, %v574_v33  ;;  %v400_v17 = vsel %vm399_vm13, %v367_v10, %v574_v33 }
  0x87   :  { %v578_v18 = vcvt.f32.s32 %v577_v56  ;;  %v580_v19 = vcvt.f32.s32 %v579_v3  ;;  %v546_v24 = vcvt.f32.s32 %v545_v45  ;;  %v548_v22 = vcvt.f32.s32 %v547_v4 }
  0x88   :  { %v612_v20 = vpop.eup %611  ;;  %v402_v26 = vsel %vm401_vm14, %v369_v31, %v576_v0  ;;  %v404_v23 = vsel %vm403_vm15, %v371_v58, %v576_v0  ;;  %v550_v5 = vcvt.f32.s32 %v549_v9  ;;  %v552_v29 = vcvt.f32.s32 %v551_v47 }
  0x89   :  { %vm430_vm0 = vcmp.lt.s32.totalorder %v398_v16, %v578_v18  ;;  %vm432_vm1 = vcmp.gt.s32.totalorder %v400_v17, %v578_v18  ;;  %v463_v30 = vadd.f32 %v462_v15, %v778_v41  ;;  %v466_v13 = vadd.f32 %v465_v28, %v783_v42 }
  0x8a   :  { %vm434_vm2 = vcmp.lt.s32.totalorder %v402_v26, %v580_v19  ;;  %vm436_vm3 = vcmp.gt.s32.totalorder %v404_v23, %v580_v19  ;;  %v449_v35 = vmul.f32 %v612_v20, %v440_v53  ;;  %v451_v62 = vmul.f32 %v612_v20, %v443_v55 }
  0x8b   :  { %v33_v32 = vcvt.s32.f32 %v546_v24  ;;  %v35_v52 = vcvt.s32.f32 %v548_v22  ;;  %v37_v27 = vcvt.s32.f32 %v550_v5  ;;  %v39_v36 = vcvt.s32.f32 %v552_v29 }
  0x8c   :  { %v581_v14 = vtrunc.f32 %v449_v35  ;;  %v583_v25 = vtrunc.f32 %v451_v62  ;;  %v431_v61 = vsel %vm430_vm0, %v398_v16, %v578_v18  ;;  %v433_v63 = vsel %vm432_vm1, %v400_v17, %v578_v18 }
  0x8d   :  { %v435_v37 = vsel %vm434_vm2, %v402_v26, %v580_v19  ;;  %v437_v38 = vsel %vm436_vm3, %v404_v23, %v580_v19  ;;  %v488_v42 = vsub.f32 %v37_v27, %v33_v32  ;;  %v489_v43 = vsub.f32 %v39_v36, %v35_v52 }
  0x8e   :  { %v614_v57 = vpop.eup %613  ;;  %v582_v39 = vcvt.f32.s32 %v581_v14  ;;  %v584_v40 = vcvt.f32.s32 %v583_v25  ;;  %v514_v16 = vlaneseq }
  0x8f   :  { %v472_v41 = vmul.f32 %v614_v57, %v463_v30  ;;  %v474_v59 = vmul.f32 %v614_v57, %v466_v13  ;;  %v490_v2 = vmul.f32 %v489_v43, %v488_v42 }
  0x90   :  { %vm453_vm4 = vcmp.lt.s32.totalorder %v431_v61, %v582_v39  ;;  %vm455_vm5 = vcmp.gt.s32.totalorder %v433_v63, %v582_v39  ;;  %vm457_vm6 = vcmp.lt.s32.totalorder %v435_v37, %v584_v40  ;;  %vm459_vm7 = vcmp.gt.s32.totalorder %v437_v38, %v584_v40 }
  0x91   :  { %v585_v60 = vtrunc.f32 %v472_v41  ;;  %v587_v7 = vtrunc.f32 %v474_v59  ;;  %v454_v44 = vsel %vm453_vm4, %v431_v61, %v582_v39  ;;  %v456_v45 = vsel %vm455_vm5, %v433_v63, %v582_v39 }
  0x92   :  { %v458_v12 = vsel %vm457_vm6, %v435_v37, %v584_v40  ;;  %v460_v34 = vsel %vm459_vm7, %v437_v38, %v584_v40  ;;  %v494_v3 = vand.u32 2147483647, %v490_v2  ;;  %v515_v18 = vshrl.u32 %v514_v16, 7 }
  0x93   :  { %v586_v1 = vcvt.f32.s32 %v585_v60  ;;  %v588_v46 = vcvt.f32.s32 %v587_v7  ;;  %v517_v19 = vand.u32 127, %v514_v16 }
  0x94   :  { %v518_v20 = vmul.u32 128, %v515_v18 }
  0x95   :  { %vm476_vm8 = vcmp.lt.s32.totalorder %v454_v44, %v586_v1  ;;  %vm478_vm9 = vcmp.gt.s32.totalorder %v456_v45, %v586_v1  ;;  %vm480_vm10 = vcmp.lt.s32.totalorder %v458_v12, %v588_v46  ;;  %vm482_vm11 = vcmp.gt.s32.totalorder %v460_v34, %v588_v46 }
  0x96   :  { %v477_v49 = vsel %vm476_vm8, %v454_v44, %v586_v1  ;;  %v479_v48 = vsel %vm478_vm9, %v456_v45, %v586_v1  ;;  %v481_v6 = vsel %vm480_vm10, %v458_v12, %v588_v46  ;;  %v483_v8 = vsel %vm482_vm11, %v460_v34, %v588_v46 }
  0x97   :  { %v484_v50 = vcvt.s32.f32 %v477_v49  ;;  %v485_v21 = vcvt.s32.f32 %v481_v6  ;;  %v486_v51 = vcvt.s32.f32 %v479_v48  ;;  %v487_v54 = vcvt.s32.f32 %v483_v8 }
  0x98   :  { %v522_v24 = vadd.s32 %v518_v20, %v517_v19 }
  0x99   :  { %v491_v10 = vsub.f32 %v486_v51, %v484_v50  ;;  %v492_v31 = vsub.f32 %v487_v54, %v485_v21  ;;  %v497_v58 = vmax.f32 %v33_v32, %v484_v50  ;;  %v498_v11 = vmax.f32 %v35_v52, %v485_v21 }
  0x9a   :  { %v499_v33 = vmin.f32 %v37_v27, %v486_v51  ;;  %v500_v0 = vmin.f32 %v39_v36, %v487_v54  ;;  %vm523_vm0 = vcmp.lt.s32.totalorder %v522_v24, 4 }
  0x9b   :  { %v493_v56 = vmul.f32 %v492_v31, %v491_v10 }
  0x9c   :  { %v504_v4 = vsub.f32 %v499_v33, %v497_v58  ;;  %v505_v9 = vsub.f32 %v500_v0, %v498_v11  ;;  %vm501_vm13 = vcmp.lt.f32.partialorder %v497_v58, %v499_v33  ;;  %vm502_vm14 = vcmp.lt.f32.partialorder %v498_v11, %v500_v0 }
  0x9d   :  { %v495_v47 = vand.u32 2147483647, %v493_v56  ;;  %vm503_vm15 = vmand %vm501_vm13, %vm502_vm14 }
  0x9e   :  { %v506_v53 = vmul.f32 %v505_v9, %v504_v4 }
  0x9f   :  { %v496_v55 = vadd.f32 %v495_v47, %v494_v3 }
  0xa0   :  { %v507_v15 = vand.u32 2147483647, %v506_v53 }
  0xa2   :  { %v508_v28 = vsub.f32 %v496_v55, %v507_v15 }
  0xa4   :  { %vm509_vm12 = vcmp.eq.f32.partialorder %v508_v28, 0.0 }
  0xa5   :  { %v510_v17 = vsel %vm509_vm12, 1.0, %v508_v28 }
  0xa6   :  { %615 = vrcp.f32 %v510_v17 }
  0xb0   :  { %v616_v22 = vpop.eup %615 }
  0xb1   :  { %v512_v26 = vmul.f32 %v616_v22, %v507_v15 }
  0xb3   :  { %v513_v23 = vsel %vm503_vm15, %v512_v26, 0.0 }
  0xb4   :  { %v524_v5 = vsub.f32 1.0, %v513_v23 }
  0xb6   :  { %v525_v29 = vsel %vm523_vm0, %v524_v5, 0.0 }
  0xb7   :  { %v526_v30 = vrot.slane %v525_v29, 4 }
  0xb9   :  { %v527_v13 = vadd.f32 %v526_v30, %v525_v29 }
  0xbb   :  { %v528_v35 = vrot.slane %v527_v13, 2 }
  0xbd   :  { %v529_v62 = vadd.f32 %v528_v35, %v527_v13 }
  0xbf   :  { %v530_v32 = vrot.slane %v529_v62, 1 }
  0xc1   :  { %v531_v52 = vadd.f32 %v530_v32, %v529_v62 }
  0xc3   :  { %532 = vst [vmem:[%s895_s1] sm:$0x1] %v531_v52 }

</bundles_post_ra>
